<compile_context>
chip_gen: v6e
topology: v6e:2x2x1
jax: 0.10.0
libtpu: 0.0.40
codegen_flags: <defaults>
</compile_context>

<pallas_src>
import functools

import jax
import jax.numpy as jnp
from jax import lax
from jax.experimental import pallas as pl
from jax.experimental.pallas import tpu as pltpu


def _round_up(x, m):
    return ((x + m - 1) // m) * m


def _vmem_capacity_bytes():
    """Per-core VMEM capacity; conservative default if the query fails."""
    try:
        info = pltpu.get_tpu_info()
        cap = int(getattr(info, "vmem_capacity_bytes", 0))
        if cap > 0:
            return cap
    except Exception:
        pass
    return 64 * 1024 * 1024  # v7x per-TensorCore (smallest current generation)


def _pick_tile_m(m, f, budget_bytes):
    """MXU-aligned M tile: >=2 grid steps when possible, minimal padding,
    and the f32 hidden slab (tile_m x F) within a fraction of VMEM."""
    if m <= 8:
        return 8
    if m < 512:
        # Small M: split into two tiles so both v7x TensorCores get work.
        return _round_up(pl.cdiv(m, 2), 8)
    best, best_waste = 256, None
    for cand in (1024, 768, 512, 256):
        if cand * f * 4 > budget_bytes // 3:      # hidden-slab budget
            continue
        m_pad = _round_up(m, cand)
        if m_pad // cand < 2:                     # keep >= 2 parallel steps
            continue
        waste = m_pad - m
        if best_waste is None or waste < best_waste:
            best, best_waste = cand, waste
    return best


# ----------------------------------------------------------------------------
# In-kernel LayerNormalization (PyTorch-exact: unbiased std, eps added to std)
# ----------------------------------------------------------------------------
def _layer_norm(x, alpha, bias, eps):
    d = x.shape[-1]
    mean = jnp.mean(x, axis=-1, keepdims=True)
    diff = x - mean
    var = jnp.sum(diff * diff, axis=-1, keepdims=True) * (1.0 / (d - 1))
    inv = pl.reciprocal(jnp.sqrt(var) + eps, approx=False)   # exact; 1e-4 tol
    return alpha * diff * inv + bias


# ----------------------------------------------------------------------------
# Plan A: all layers' weights VMEM-resident, grid = (m_tiles,)
# ----------------------------------------------------------------------------
def _decoder_resident_kernel(alpha_ref, bias_ref, x_ref,
                             w1_ref, b1_ref, w2_ref, b2_ref, o_ref,
                             *, n_layers, eps, unroll):
    x = x_ref[...].astype(jnp.float32)

    def layer_body(l, x):
        w1 = w1_ref[l]                                    # (D, F)  bf16
        b1 = b1_ref[l]                                    # (1, F)  f32
        w2 = w2_ref[l]                                    # (F, D)  bf16
        b2 = b2_ref[l]                                    # (1, D)  f32
        h = jnp.dot(x.astype(jnp.bfloat16), w1,
                    preferred_element_type=jnp.float32)   # MXU, f32 acc
        h = jnp.maximum(h + b1, 0.0)                      # bias + ReLU in f32
        y = jnp.dot(h.astype(jnp.bfloat16), w2,
                    preferred_element_type=jnp.float32)
        return x + y + b2                                 # residual in f32

    if unroll:
        for l in range(n_layers):                         # short stacks: unroll
            x = layer_body(l, x)
    else:
        x = lax.fori_loop(0, n_layers, layer_body, x)     # deep stacks: bound live set

    o_ref[...] = _layer_norm(x, alpha_ref[0], bias_ref[0], eps).astype(o_ref.dtype)


def _call_resident(x2, w1, b1, w2, b2, alpha, bias, *, tile_m, n_layers, eps,
                   unroll, vmem_limit, cost, single_buffer):
    m_pad, d = x2.shape
    L, D, F = w1.shape

    def const_spec(shape):
        # Resident arrays: same block every step -> single-buffer when supported.
        idx = (lambda i: (0, 0, 0)) if len(shape) == 3 else (lambda i: (0, 0))
        if single_buffer:
            return pl.BlockSpec(shape, idx, pipeline_mode=pl.Buffered(1))
        return pl.BlockSpec(shape, idx)

    return pl.pallas_call(
        functools.partial(_decoder_resident_kernel, n_layers=n_layers, eps=eps,
                          unroll=unroll),
        out_shape=jax.ShapeDtypeStruct((m_pad, d), jnp.float32),
        grid=(m_pad // tile_m,),
        in_specs=[
            pl.BlockSpec(memory_space=pltpu.SMEM),            # alpha (1,)
            pl.BlockSpec(memory_space=pltpu.SMEM),            # bias  (1,)
            pl.BlockSpec((tile_m, d), lambda i: (i, 0)),      # x rows (pipelined)
            const_spec((L, D, F)),                            # w1 resident
            const_spec((L, 1, F)),                            # b1 resident
            const_spec((L, F, D)),                            # w2 resident
            const_spec((L, 1, D)),                            # b2 resident
        ],
        out_specs=pl.BlockSpec((tile_m, d), lambda i: (i, 0)),
        compiler_params=pltpu.CompilerParams(
            dimension_semantics=("parallel",),                # shard M over TCs
            vmem_limit_bytes=vmem_limit,
        ),
        cost_estimate=cost,
    )(alpha, bias, x2, w1, b1, w2, b2)


# ----------------------------------------------------------------------------
# Plan B: weight streaming, grid = (m_tiles, L); activation in VMEM scratch
# ----------------------------------------------------------------------------
def _decoder_stream_kernel(alpha_ref, bias_ref, x_ref,
                           w1_ref, b1_ref, w2_ref, b2_ref, o_ref, acc_ref,
                           *, eps):
    l = pl.program_id(1)

    @pl.when(l == 0)
    def _():
        acc_ref[...] = x_ref[...].astype(jnp.float32)

    x = acc_ref[...]
    w1 = w1_ref[0]                                        # (D, F) bf16 (this layer)
    b1 = b1_ref[0]                                        # (1, F) f32
    w2 = w2_ref[0]                                        # (F, D) bf16
    b2 = b2_ref[0]                                        # (1, D) f32
    h = jnp.dot(x.astype(jnp.bfloat16), w1, preferred_element_type=jnp.float32)
    h = jnp.maximum(h + b1, 0.0)
    y = jnp.dot(h.astype(jnp.bfloat16), w2, preferred_element_type=jnp.float32)
    x = x + y + b2
    acc_ref[...] = x

    @pl.when(l == pl.num_programs(1) - 1)
    def _():
        o_ref[...] = _layer_norm(x, alpha_ref[0], bias_ref[0], eps).astype(o_ref.dtype)


def _call_stream(x2, w1, b1, w2, b2, alpha, bias, *, tile_m, eps,
                 vmem_limit, cost):
    m_pad, d = x2.shape
    L, D, F = w1.shape
    return pl.pallas_call(
        functools.partial(_decoder_stream_kernel, eps=eps),
        out_shape=jax.ShapeDtypeStruct((m_pad, d), jnp.float32),
        grid=(m_pad // tile_m, L),
        in_specs=[
            pl.BlockSpec(memory_space=pltpu.SMEM),                # alpha
            pl.BlockSpec(memory_space=pltpu.SMEM),                # bias
            pl.BlockSpec((tile_m, d), lambda i, l: (i, 0)),       # x (loaded once / m-tile)
            pl.BlockSpec((1, D, F), lambda i, l: (l, 0, 0)),      # w1: one layer / step
            pl.BlockSpec((1, 1, F), lambda i, l: (l, 0, 0)),      # b1
            pl.BlockSpec((1, F, D), lambda i, l: (l, 0, 0)),      # w2
            pl.BlockSpec((1, 1, D), lambda i, l: (l, 0, 0)),      # b2
        ],
        out_specs=pl.BlockSpec((tile_m, d), lambda i, l: (i, 0)),
        scratch_shapes=[pltpu.VMEM((tile_m, d), jnp.float32)],    # activation carry
        compiler_params=pltpu.CompilerParams(
            dimension_semantics=("parallel", "arbitrary"),
            vmem_limit_bytes=vmem_limit,
        ),
        cost_estimate=cost,
    )(alpha, bias, x2, w1, b1, w2, b2)


# ----------------------------------------------------------------------------
# Wrapper
# ----------------------------------------------------------------------------
def decoder_forward(x, stacked_params, alpha, bias, *, n_layers, eps=1e-6,
                    tile_m=None, force_stream=None, unroll_layers=None):
    """x: (B, S, D) float32.  stacked_params: (w1, b1, w2, b2) stacked over layers."""
    w1, b1, w2, b2 = stacked_params
    b_, s, d = x.shape
    m = b_ * s
    L, D, F = w1.shape

    cap = _vmem_capacity_bytes()
    vmem_limit = max(16 * 2**20, int(cap * 0.9))         # use the chip, not 32 MiB
    budget = int(cap * 0.70)                             # plan-selection budget

    if tile_m is None:
        tile_m = _pick_tile_m(m, F, budget)
    tile_m = max(8, _round_up(int(tile_m), 8))
    m_pad = _round_up(m, tile_m)

    # Footprint of the all-layers-resident plan (single-buffered weights,
    # double-buffered x/out tiles, one (tile_m, F) f32 hidden slab + slack).
    weight_bytes = (w1.size + w2.size) * 2 + (b1.size + b2.size) * 4
    act_bytes = 2 * 2 * tile_m * d * 4
    h_bytes = tile_m * F * 4
    resident_fits = (weight_bytes + act_bytes + 2 * h_bytes) <= budget
    use_stream = (not resident_fits) if force_stream is None else bool(force_stream)
    unroll = (n_layers <= 4) if unroll_layers is None else bool(unroll_layers)

    # f32 activation in/out keeps the residual path exact vs the reference.
    # TODO(synk): optionally stream x/out in bf16 to halve HBM traffic on v5e.
    x2 = x.reshape(m, d).astype(jnp.float32)
    if m_pad != m:
        # TODO(synk): a masked tail-tile store would avoid this extra HBM copy;
        # _pick_tile_m keeps the padded waste small instead.
        x2 = jnp.pad(x2, ((0, m_pad - m), (0, 0)))

    w_reads = (m_pad // tile_m) if use_stream else 1
    cost = pl.CostEstimate(
        flops=4 * m_pad * L * D * F,
        transcendentals=2 * m_pad,
        bytes_accessed=w_reads * weight_bytes + 2 * m_pad * d * 4,
    )

    if use_stream:
        out = _call_stream(x2, w1, b1, w2, b2, alpha, bias,
                           tile_m=tile_m, eps=eps,
                           vmem_limit=vmem_limit, cost=cost)
    else:
        try:
            out = _call_resident(x2, w1, b1, w2, b2, alpha, bias,
                                 tile_m=tile_m, n_layers=n_layers, eps=eps,
                                 unroll=unroll, vmem_limit=vmem_limit,
                                 cost=cost, single_buffer=True)
        except Exception:
            # Fallback if pipeline_mode=Buffered(1) is unsupported in this jax:
            # same plan with default double-buffering.
            out = _call_resident(x2, w1, b1, w2, b2, alpha, bias,
                                 tile_m=tile_m, n_layers=n_layers, eps=eps,
                                 unroll=unroll, vmem_limit=vmem_limit,
                                 cost=cost, single_buffer=False)

    if m_pad != m:
        out = out[:m]
    return out.reshape(b_, s, d)


# ----------------------------------------------------------------------------
# Decoder: matches the reference module's forward semantics
# ----------------------------------------------------------------------------
class Decoder:
    def __init__(self, layer_params_list, eps=1e-6):
        # Stack per-layer params so the fused kernel can loop over layers.
        # Weights cast to bf16 once (MXU-native); biases stay f32.
        self.w1 = jnp.stack([p[0] for p in layer_params_list]).astype(jnp.bfloat16)
        self.b1 = jnp.stack([p[1] for p in layer_params_list]).astype(jnp.float32)
        self.w2 = jnp.stack([p[2] for p in layer_params_list]).astype(jnp.bfloat16)
        self.b2 = jnp.stack([p[3] for p in layer_params_list]).astype(jnp.float32)
        self.n_layers = len(layer_params_list)
        # LayerNormalization params: nn.Parameter(torch.ones(1) / torch.zeros(1))
        self.alpha = jnp.ones((1,), jnp.float32)
        self.bias = jnp.zeros((1,), jnp.float32)
        self.eps = eps

    def __call__(self, x, encoder_output, src_mask, tgt_mask, *, tile_m=None,
                 force_stream=None, unroll_layers=None):
        # encoder_output / masks are part of the reference call signature; the
        # injected layers here are synthetic residual FFNs that do not use them.
        # TODO(synk): real injected decoder layers (self-attn / cross-attn) are
        # external to the reference Decoder module and are not reproduced here.
        return decoder_forward(
            x, (self.w1, self.b1, self.w2, self.b2),
            self.alpha, self.bias,
            n_layers=self.n_layers, eps=self.eps, tile_m=tile_m,
            force_stream=force_stream, unroll_layers=unroll_layers)


# ----------------------------------------------------------------------------
# Demo / smoke test
# ----------------------------------------------------------------------------
def _init_layer_params(key, d_model, d_ff):
    k1, k2 = jax.random.split(key)
    w1 = jax.random.normal(k1, (d_model, d_ff), jnp.float32) * 0.02
    b1 = jnp.zeros((1, d_ff), jnp.float32)
    w2 = jax.random.normal(k2, (d_ff, d_model), jnp.float32) * 0.02
    b2 = jnp.zeros((1, d_model), jnp.float32)
    return (w1, b1, w2, b2)


if __name__ == "__main__":
    key = jax.random.PRNGKey(0)
    batch, seq, d_model, d_ff = 2, 8, 32, 64
    n_layers = 2
    eps = 1e-6

    k_x, k_enc, *k_layers = jax.random.split(key, 2 + n_layers)
    x = jax.random.normal(k_x, (batch, seq, d_model), jnp.float32)
    encoder_output = jax.random.normal(k_enc, (batch, seq, d_model), jnp.float32)
    src_mask = jnp.ones((batch, 1, 1, seq), jnp.float32)
    tgt_mask = jnp.tril(jnp.ones((seq, seq), jnp.float32))[None, None]

    layer_params = [_init_layer_params(k, d_model, d_ff) for k in k_layers]
    decoder = Decoder(layer_params, eps=eps)

    # Pure-JAX reference of the same computation (same bf16 matmul inputs,
    # f32 accumulation / elementwise).
    ref = x.reshape(batch * seq, d_model).astype(jnp.float32)
    for (w1, b1, w2, b2) in layer_params:
        h = jnp.dot(ref.astype(jnp.bfloat16), w1.astype(jnp.bfloat16),
                    preferred_element_type=jnp.float32)
        h = jnp.maximum(h + b1, 0.0)
        y = jnp.dot(h.astype(jnp.bfloat16), w2.astype(jnp.bfloat16),
                    preferred_element_type=jnp.float32)
        ref = ref + y + b2
    mean = ref.mean(-1, keepdims=True)
    diff = ref - mean
    std = jnp.sqrt((diff * diff).sum(-1, keepdims=True) / (d_model - 1))
    ref = (1.0 * diff / (std + eps) + 0.0).reshape(batch, seq, d_model)

    # 1) Default plan: resident weights, unrolled layer loop, >=2 parallel M tiles.
    out_a = jax.block_until_ready(decoder(x, encoder_output, src_mask, tgt_mask))
    assert out_a.shape == (batch, seq, d_model) and out_a.dtype == jnp.float32
    assert jnp.allclose(out_a, ref, atol=1e-4, rtol=1e-4)

    # 2) Resident plan with the lax.fori_loop layer loop (deep-stack path).
    out_b = jax.block_until_ready(
        decoder(x, encoder_output, src_mask, tgt_mask, unroll_layers=False))
    assert jnp.allclose(out_b, ref, atol=1e-4, rtol=1e-4)

    # 3) Weight-streaming plan (v7x / large-model fallback): layer grid axis,
    #    activation carried in VMEM scratch, LayerNorm epilogue on last layer.
    out_c = jax.block_until_ready(
        decoder(x, encoder_output, src_mask, tgt_mask, tile_m=8, force_stream=True))
    assert jnp.allclose(out_c, ref, atol=1e-4, rtol=1e-4)

    print("KERNEL_OK")
</pallas_src>

<mosaic_0001>
module attributes {stable_mosaic.version = 11 : i64} {
  func.func @_decoder_resident_kernel(%arg0: i32, %arg1: memref<1xf32, #tpu.memory_space<smem>>, %arg2: memref<1xf32, #tpu.memory_space<smem>>, %arg3: memref<8x32xf32, #tpu.memory_space<vmem>>, %arg4: memref<2x32x64xbf16, #tpu.memory_space<vmem>>, %arg5: memref<2x1x64xf32, #tpu.memory_space<vmem>>, %arg6: memref<2x64x32xbf16, #tpu.memory_space<vmem>>, %arg7: memref<2x1x32xf32, #tpu.memory_space<vmem>>, %arg8: memref<8x32xf32, #tpu.memory_space<vmem>>) attributes {dimension_semantics = [#tpu.dimension_semantics<parallel>], iteration_bounds = array<i64: 2>, scalar_prefetch = 0 : i64, scratch_operands = 0 : i64, tpu.core_type = #tpu.core_type<tc>, window_params = [{transform_indices = @transform_0, window_bounds = array<i64: 1>}, {transform_indices = @transform_1, window_bounds = array<i64: 1>}, {transform_indices = @transform_2, window_bounds = array<i64: 8, 32>}, {pipeline_mode = #tpu.pipeline_mode<synchronous>, transform_indices = @transform_3, window_bounds = array<i64: 2, 32, 64>}, {pipeline_mode = #tpu.pipeline_mode<synchronous>, transform_indices = @transform_4, window_bounds = array<i64: 2, 1, 64>}, {pipeline_mode = #tpu.pipeline_mode<synchronous>, transform_indices = @transform_5, window_bounds = array<i64: 2, 64, 32>}, {pipeline_mode = #tpu.pipeline_mode<synchronous>, transform_indices = @transform_6, window_bounds = array<i64: 2, 1, 32>}, {transform_indices = @transform_7, window_bounds = array<i64: 8, 32>}]} {
    %c0 = arith.constant 0 : index
    %c0_0 = arith.constant 0 : index
    %0 = vector.load %arg3[%c0, %c0_0] : memref<8x32xf32, #tpu.memory_space<vmem>>, vector<8x32xf32>
    %c0_1 = arith.constant 0 : index
    %c0_2 = arith.constant 0 : index
    %c0_3 = arith.constant 0 : index
    %1 = vector.load %arg4[%c0_1, %c0_2, %c0_3] : memref<2x32x64xbf16, #tpu.memory_space<vmem>>, vector<1x32x64xbf16>
    %2 = vector.shape_cast %1 : vector<1x32x64xbf16> to vector<32x64xbf16>
    %c0_4 = arith.constant 0 : index
    %c0_5 = arith.constant 0 : index
    %c0_6 = arith.constant 0 : index
    %3 = vector.load %arg5[%c0_4, %c0_5, %c0_6] : memref<2x1x64xf32, #tpu.memory_space<vmem>>, vector<1x1x64xf32>
    %4 = vector.shape_cast %3 : vector<1x1x64xf32> to vector<1x64xf32>
    %c0_7 = arith.constant 0 : index
    %c0_8 = arith.constant 0 : index
    %c0_9 = arith.constant 0 : index
    %5 = vector.load %arg6[%c0_7, %c0_8, %c0_9] : memref<2x64x32xbf16, #tpu.memory_space<vmem>>, vector<1x64x32xbf16>
    %6 = vector.shape_cast %5 : vector<1x64x32xbf16> to vector<64x32xbf16>
    %c0_10 = arith.constant 0 : index
    %c0_11 = arith.constant 0 : index
    %c0_12 = arith.constant 0 : index
    %7 = vector.load %arg7[%c0_10, %c0_11, %c0_12] : memref<2x1x32xf32, #tpu.memory_space<vmem>>, vector<1x1x32xf32>
    %8 = vector.shape_cast %7 : vector<1x1x32xf32> to vector<1x32xf32>
    %9 = arith.truncf %0 : vector<8x32xf32> to vector<8x32xbf16>
    %cst = arith.constant dense<0.000000e+00> : vector<8x64xf32>
    %10 = tpu.matmul %9, %2, %cst {dimension_numbers = #tpu.dot_dimension_numbers<[1], [0], [0], [1], [0, 0, 1, 1], [], []>} : vector<8x32xbf16>, vector<32x64xbf16>, vector<8x64xf32> -> vector<8x64xf32>
    %11 = vector.broadcast %4 : vector<1x64xf32> to vector<8x64xf32>
    %12 = arith.addf %10, %11 : vector<8x64xf32>
    %cst_13 = arith.constant 0.000000e+00 : f32
    %13 = vector.broadcast %cst_13 : f32 to vector<8x64xf32>
    %14 = arith.maximumf %12, %13 : vector<8x64xf32>
    %15 = arith.truncf %14 : vector<8x64xf32> to vector<8x64xbf16>
    %cst_14 = arith.constant dense<0.000000e+00> : vector<8x32xf32>
    %16 = tpu.matmul %15, %6, %cst_14 {dimension_numbers = #tpu.dot_dimension_numbers<[1], [0], [0], [1], [0, 0, 1, 1], [], []>} : vector<8x64xbf16>, vector<64x32xbf16>, vector<8x32xf32> -> vector<8x32xf32>
    %17 = arith.addf %0, %16 : vector<8x32xf32>
    %18 = vector.broadcast %8 : vector<1x32xf32> to vector<8x32xf32>
    %19 = arith.addf %17, %18 : vector<8x32xf32>
    %c1 = arith.constant 1 : index
    %c0_15 = arith.constant 0 : index
    %c0_16 = arith.constant 0 : index
    %20 = vector.load %arg4[%c1, %c0_15, %c0_16] : memref<2x32x64xbf16, #tpu.memory_space<vmem>>, vector<1x32x64xbf16>
    %21 = vector.shape_cast %20 : vector<1x32x64xbf16> to vector<32x64xbf16>
    %c1_17 = arith.constant 1 : index
    %c0_18 = arith.constant 0 : index
    %c0_19 = arith.constant 0 : index
    %22 = vector.load %arg5[%c1_17, %c0_18, %c0_19] : memref<2x1x64xf32, #tpu.memory_space<vmem>>, vector<1x1x64xf32>
    %23 = vector.shape_cast %22 : vector<1x1x64xf32> to vector<1x64xf32>
    %c1_20 = arith.constant 1 : index
    %c0_21 = arith.constant 0 : index
    %c0_22 = arith.constant 0 : index
    %24 = vector.load %arg6[%c1_20, %c0_21, %c0_22] : memref<2x64x32xbf16, #tpu.memory_space<vmem>>, vector<1x64x32xbf16>
    %25 = vector.shape_cast %24 : vector<1x64x32xbf16> to vector<64x32xbf16>
    %c1_23 = arith.constant 1 : index
    %c0_24 = arith.constant 0 : index
    %c0_25 = arith.constant 0 : index
    %26 = vector.load %arg7[%c1_23, %c0_24, %c0_25] : memref<2x1x32xf32, #tpu.memory_space<vmem>>, vector<1x1x32xf32>
    %27 = vector.shape_cast %26 : vector<1x1x32xf32> to vector<1x32xf32>
    %28 = arith.truncf %19 : vector<8x32xf32> to vector<8x32xbf16>
    %cst_26 = arith.constant dense<0.000000e+00> : vector<8x64xf32>
    %29 = tpu.matmul %28, %21, %cst_26 {dimension_numbers = #tpu.dot_dimension_numbers<[1], [0], [0], [1], [0, 0, 1, 1], [], []>} : vector<8x32xbf16>, vector<32x64xbf16>, vector<8x64xf32> -> vector<8x64xf32>
    %30 = vector.broadcast %23 : vector<1x64xf32> to vector<8x64xf32>
    %31 = arith.addf %29, %30 : vector<8x64xf32>
    %cst_27 = arith.constant 0.000000e+00 : f32
    %32 = vector.broadcast %cst_27 : f32 to vector<8x64xf32>
    %33 = arith.maximumf %31, %32 : vector<8x64xf32>
    %34 = arith.truncf %33 : vector<8x64xf32> to vector<8x64xbf16>
    %cst_28 = arith.constant dense<0.000000e+00> : vector<8x32xf32>
    %35 = tpu.matmul %34, %25, %cst_28 {dimension_numbers = #tpu.dot_dimension_numbers<[1], [0], [0], [1], [0, 0, 1, 1], [], []>} : vector<8x64xbf16>, vector<64x32xbf16>, vector<8x32xf32> -> vector<8x32xf32>
    %36 = arith.addf %19, %35 : vector<8x32xf32>
    %37 = vector.broadcast %27 : vector<1x32xf32> to vector<8x32xf32>
    %38 = arith.addf %36, %37 : vector<8x32xf32>
    %c0_29 = arith.constant 0 : index
    %39 = memref.load %arg1[%c0_29] : memref<1xf32, #tpu.memory_space<smem>>
    %c0_30 = arith.constant 0 : index
    %40 = memref.load %arg2[%c0_30] : memref<1xf32, #tpu.memory_space<smem>>
    %cst_31 = arith.constant dense<0.000000e+00> : vector<8xf32>
    %41 = vector.multi_reduction <add>, %38, %cst_31 [1] : vector<8x32xf32> to vector<8xf32>
    %42 = vector.shape_cast %41 : vector<8xf32> to vector<8x1xf32>
    %cst_32 = arith.constant 3.200000e+01 : f32
    %43 = vector.broadcast %cst_32 : f32 to vector<8x1xf32>
    %44 = arith.divf %42, %43 : vector<8x1xf32>
    %45 = vector.broadcast %44 : vector<8x1xf32> to vector<8x32xf32>
    %46 = arith.subf %38, %45 : vector<8x32xf32>
    %47 = arith.mulf %46, %46 : vector<8x32xf32>
    %cst_33 = arith.constant dense<0.000000e+00> : vector<8xf32>
    %48 = vector.multi_reduction <add>, %47, %cst_33 [1] : vector<8x32xf32> to vector<8xf32>
    %49 = vector.shape_cast %48 : vector<8xf32> to vector<8x1xf32>
    %cst_34 = arith.constant 0.0322580636 : f32
    %50 = vector.broadcast %cst_34 : f32 to vector<8x1xf32>
    %51 = arith.mulf %49, %50 : vector<8x1xf32>
    %52 = math.sqrt %51 : vector<8x1xf32>
    %cst_35 = arith.constant 9.99999997E-7 : f32
    %53 = vector.broadcast %cst_35 : f32 to vector<8x1xf32>
    %54 = arith.addf %52, %53 : vector<8x1xf32>
    %55 = tpu.reciprocal %54 : vector<8x1xf32> -> vector<8x1xf32>
    %56 = vector.broadcast %39 : f32 to vector<8x32xf32>
    %57 = arith.mulf %56, %46 : vector<8x32xf32>
    %58 = vector.broadcast %55 : vector<8x1xf32> to vector<8x32xf32>
    %59 = arith.mulf %57, %58 : vector<8x32xf32>
    %60 = vector.broadcast %40 : f32 to vector<8x32xf32>
    %61 = arith.addf %59, %60 : vector<8x32xf32>
    %c0_36 = arith.constant 0 : index
    %c0_37 = arith.constant 0 : index
    %62 = vector.load %arg8[%c0_36, %c0_37] : memref<8x32xf32, #tpu.memory_space<vmem>>, vector<8x32xf32>
    tpu.vector_store %arg8[%c0_36, %c0_37], %61 {strides = array<i32>} : memref<8x32xf32, #tpu.memory_space<vmem>>, vector<8x32xf32>,
    return
  }
  func.func @transform_0(%arg0: i32) -> i32 {
    %c0_i32 = arith.constant 0 : i32
    %c0_i32_0 = arith.constant 0 : i32
    return %c0_i32 : i32
  }
  func.func @transform_1(%arg0: i32) -> i32 {
    %c0_i32 = arith.constant 0 : i32
    %c0_i32_0 = arith.constant 0 : i32
    return %c0_i32 : i32
  }
  func.func @transform_2(%arg0: i32) -> (i32, i32) {
    %c0_i32 = arith.constant 0 : i32
    %c0_i32_0 = arith.constant 0 : i32
    return %arg0, %c0_i32 : i32, i32
  }
  func.func @transform_3(%arg0: i32) -> (i32, i32, i32) {
    %c0_i32 = arith.constant 0 : i32
    %c0_i32_0 = arith.constant 0 : i32
    %c0_i32_1 = arith.constant 0 : i32
    %c0_i32_2 = arith.constant 0 : i32
    return %c0_i32, %c0_i32_0, %c0_i32_1 : i32, i32, i32
  }
  func.func @transform_4(%arg0: i32) -> (i32, i32, i32) {
    %c0_i32 = arith.constant 0 : i32
    %c0_i32_0 = arith.constant 0 : i32
    %c0_i32_1 = arith.constant 0 : i32
    %c0_i32_2 = arith.constant 0 : i32
    return %c0_i32, %c0_i32_0, %c0_i32_1 : i32, i32, i32
  }
  func.func @transform_5(%arg0: i32) -> (i32, i32, i32) {
    %c0_i32 = arith.constant 0 : i32
    %c0_i32_0 = arith.constant 0 : i32
    %c0_i32_1 = arith.constant 0 : i32
    %c0_i32_2 = arith.constant 0 : i32
    return %c0_i32, %c0_i32_0, %c0_i32_1 : i32, i32, i32
  }
  func.func @transform_6(%arg0: i32) -> (i32, i32, i32) {
    %c0_i32 = arith.constant 0 : i32
    %c0_i32_0 = arith.constant 0 : i32
    %c0_i32_1 = arith.constant 0 : i32
    %c0_i32_2 = arith.constant 0 : i32
    return %c0_i32, %c0_i32_0, %c0_i32_1 : i32, i32, i32
  }
  func.func @transform_7(%arg0: i32) -> (i32, i32) {
    %c0_i32 = arith.constant 0 : i32
    %c0_i32_0 = arith.constant 0 : i32
    return %arg0, %c0_i32 : i32, i32
  }
}

module attributes {stable_mosaic.version = 11 : i64} {
  func.func @_decoder_resident_kernel(%arg0: i32, %arg1: memref<1xf32, #tpu.memory_space<smem>>, %arg2: memref<1xf32, #tpu.memory_space<smem>>, %arg3: memref<8x32xf32, #tpu.memory_space<vmem>>, %arg4: memref<2x32x64xbf16, #tpu.memory_space<vmem>>, %arg5: memref<2x1x64xf32, #tpu.memory_space<vmem>>, %arg6: memref<2x64x32xbf16, #tpu.memory_space<vmem>>, %arg7: memref<2x1x32xf32, #tpu.memory_space<vmem>>, %arg8: memref<8x32xf32, #tpu.memory_space<vmem>>) attributes {dimension_semantics = [#tpu.dimension_semantics<parallel>], iteration_bounds = array<i64: 2>, scalar_prefetch = 0 : i64, scratch_operands = 0 : i64, tpu.core_type = #tpu.core_type<tc>, window_params = [{transform_indices = @transform_0, window_bounds = array<i64: 1>}, {transform_indices = @transform_1, window_bounds = array<i64: 1>}, {transform_indices = @transform_2, window_bounds = array<i64: 8, 32>}, {pipeline_mode = #tpu.pipeline_mode<synchronous>, transform_indices = @transform_3, window_bounds = array<i64: 2, 32, 64>}, {pipeline_mode = #tpu.pipeline_mode<synchronous>, transform_indices = @transform_4, window_bounds = array<i64: 2, 1, 64>}, {pipeline_mode = #tpu.pipeline_mode<synchronous>, transform_indices = @transform_5, window_bounds = array<i64: 2, 64, 32>}, {pipeline_mode = #tpu.pipeline_mode<synchronous>, transform_indices = @transform_6, window_bounds = array<i64: 2, 1, 32>}, {transform_indices = @transform_7, window_bounds = array<i64: 8, 32>}]} {
    %c0 = arith.constant 0 : index
    %c0_0 = arith.constant 0 : index
    %0 = vector.load %arg3[%c0, %c0_0] : memref<8x32xf32, #tpu.memory_space<vmem>>, vector<8x32xf32>
    %c0_1 = arith.constant 0 : index
    %c0_2 = arith.constant 0 : index
    %c0_3 = arith.constant 0 : index
    %1 = vector.load %arg4[%c0_1, %c0_2, %c0_3] : memref<2x32x64xbf16, #tpu.memory_space<vmem>>, vector<1x32x64xbf16>
    %2 = vector.shape_cast %1 : vector<1x32x64xbf16> to vector<32x64xbf16>
    %c0_4 = arith.constant 0 : index
    %c0_5 = arith.constant 0 : index
    %c0_6 = arith.constant 0 : index
    %3 = vector.load %arg5[%c0_4, %c0_5, %c0_6] : memref<2x1x64xf32, #tpu.memory_space<vmem>>, vector<1x1x64xf32>
    %4 = vector.shape_cast %3 : vector<1x1x64xf32> to vector<1x64xf32>
    %c0_7 = arith.constant 0 : index
    %c0_8 = arith.constant 0 : index
    %c0_9 = arith.constant 0 : index
    %5 = vector.load %arg6[%c0_7, %c0_8, %c0_9] : memref<2x64x32xbf16, #tpu.memory_space<vmem>>, vector<1x64x32xbf16>
    %6 = vector.shape_cast %5 : vector<1x64x32xbf16> to vector<64x32xbf16>
    %c0_10 = arith.constant 0 : index
    %c0_11 = arith.constant 0 : index
    %c0_12 = arith.constant 0 : index
    %7 = vector.load %arg7[%c0_10, %c0_11, %c0_12] : memref<2x1x32xf32, #tpu.memory_space<vmem>>, vector<1x1x32xf32>
    %8 = vector.shape_cast %7 : vector<1x1x32xf32> to vector<1x32xf32>
    %9 = arith.truncf %0 : vector<8x32xf32> to vector<8x32xbf16>
    %cst = arith.constant dense<0.000000e+00> : vector<8x64xf32>
    %10 = tpu.matmul %9, %2, %cst {dimension_numbers = #tpu.dot_dimension_numbers<[1], [0], [0], [1], [0, 0, 1, 1], [], []>} : vector<8x32xbf16>, vector<32x64xbf16>, vector<8x64xf32> -> vector<8x64xf32>
    %11 = vector.broadcast %4 : vector<1x64xf32> to vector<8x64xf32>
    %12 = arith.addf %10, %11 : vector<8x64xf32>
    %cst_13 = arith.constant 0.000000e+00 : f32
    %13 = vector.broadcast %cst_13 : f32 to vector<8x64xf32>
    %14 = arith.maximumf %12, %13 : vector<8x64xf32>
    %15 = arith.truncf %14 : vector<8x64xf32> to vector<8x64xbf16>
    %cst_14 = arith.constant dense<0.000000e+00> : vector<8x32xf32>
    %16 = tpu.matmul %15, %6, %cst_14 {dimension_numbers = #tpu.dot_dimension_numbers<[1], [0], [0], [1], [0, 0, 1, 1], [], []>} : vector<8x64xbf16>, vector<64x32xbf16>, vector<8x32xf32> -> vector<8x32xf32>
    %17 = arith.addf %0, %16 : vector<8x32xf32>
    %18 = vector.broadcast %8 : vector<1x32xf32> to vector<8x32xf32>
    %19 = arith.addf %17, %18 : vector<8x32xf32>
    %c1 = arith.constant 1 : index
    %c0_15 = arith.constant 0 : index
    %c0_16 = arith.constant 0 : index
    %20 = vector.load %arg4[%c1, %c0_15, %c0_16] : memref<2x32x64xbf16, #tpu.memory_space<vmem>>, vector<1x32x64xbf16>
    %21 = vector.shape_cast %20 : vector<1x32x64xbf16> to vector<32x64xbf16>
    %c1_17 = arith.constant 1 : index
    %c0_18 = arith.constant 0 : index
    %c0_19 = arith.constant 0 : index
    %22 = vector.load %arg5[%c1_17, %c0_18, %c0_19] : memref<2x1x64xf32, #tpu.memory_space<vmem>>, vector<1x1x64xf32>
    %23 = vector.shape_cast %22 : vector<1x1x64xf32> to vector<1x64xf32>
    %c1_20 = arith.constant 1 : index
    %c0_21 = arith.constant 0 : index
    %c0_22 = arith.constant 0 : index
    %24 = vector.load %arg6[%c1_20, %c0_21, %c0_22] : memref<2x64x32xbf16, #tpu.memory_space<vmem>>, vector<1x64x32xbf16>
    %25 = vector.shape_cast %24 : vector<1x64x32xbf16> to vector<64x32xbf16>
    %c1_23 = arith.constant 1 : index
    %c0_24 = arith.constant 0 : index
    %c0_25 = arith.constant 0 : index
    %26 = vector.load %arg7[%c1_23, %c0_24, %c0_25] : memref<2x1x32xf32, #tpu.memory_space<vmem>>, vector<1x1x32xf32>
    %27 = vector.shape_cast %26 : vector<1x1x32xf32> to vector<1x32xf32>
    %28 = arith.truncf %19 : vector<8x32xf32> to vector<8x32xbf16>
    %cst_26 = arith.constant dense<0.000000e+00> : vector<8x64xf32>
    %29 = tpu.matmul %28, %21, %cst_26 {dimension_numbers = #tpu.dot_dimension_numbers<[1], [0], [0], [1], [0, 0, 1, 1], [], []>} : vector<8x32xbf16>, vector<32x64xbf16>, vector<8x64xf32> -> vector<8x64xf32>
    %30 = vector.broadcast %23 : vector<1x64xf32> to vector<8x64xf32>
    %31 = arith.addf %29, %30 : vector<8x64xf32>
    %cst_27 = arith.constant 0.000000e+00 : f32
    %32 = vector.broadcast %cst_27 : f32 to vector<8x64xf32>
    %33 = arith.maximumf %31, %32 : vector<8x64xf32>
    %34 = arith.truncf %33 : vector<8x64xf32> to vector<8x64xbf16>
    %cst_28 = arith.constant dense<0.000000e+00> : vector<8x32xf32>
    %35 = tpu.matmul %34, %25, %cst_28 {dimension_numbers = #tpu.dot_dimension_numbers<[1], [0], [0], [1], [0, 0, 1, 1], [], []>} : vector<8x64xbf16>, vector<64x32xbf16>, vector<8x32xf32> -> vector<8x32xf32>
    %36 = arith.addf %19, %35 : vector<8x32xf32>
    %37 = vector.broadcast %27 : vector<1x32xf32> to vector<8x32xf32>
    %38 = arith.addf %36, %37 : vector<8x32xf32>
    %c0_29 = arith.constant 0 : index
    %39 = memref.load %arg1[%c0_29] : memref<1xf32, #tpu.memory_space<smem>>
    %c0_30 = arith.constant 0 : index
    %40 = memref.load %arg2[%c0_30] : memref<1xf32, #tpu.memory_space<smem>>
    %cst_31 = arith.constant dense<0.000000e+00> : vector<8xf32>
    %41 = vector.multi_reduction <add>, %38, %cst_31 [1] : vector<8x32xf32> to vector<8xf32>
    %42 = vector.shape_cast %41 : vector<8xf32> to vector<8x1xf32>
    %cst_32 = arith.constant 3.200000e+01 : f32
    %43 = vector.broadcast %cst_32 : f32 to vector<8x1xf32>
    %44 = arith.divf %42, %43 : vector<8x1xf32>
    %45 = vector.broadcast %44 : vector<8x1xf32> to vector<8x32xf32>
    %46 = arith.subf %38, %45 : vector<8x32xf32>
    %47 = arith.mulf %46, %46 : vector<8x32xf32>
    %cst_33 = arith.constant dense<0.000000e+00> : vector<8xf32>
    %48 = vector.multi_reduction <add>, %47, %cst_33 [1] : vector<8x32xf32> to vector<8xf32>
    %49 = vector.shape_cast %48 : vector<8xf32> to vector<8x1xf32>
    %cst_34 = arith.constant 0.0322580636 : f32
    %50 = vector.broadcast %cst_34 : f32 to vector<8x1xf32>
    %51 = arith.mulf %49, %50 : vector<8x1xf32>
    %52 = math.sqrt %51 : vector<8x1xf32>
    %cst_35 = arith.constant 9.99999997E-7 : f32
    %53 = vector.broadcast %cst_35 : f32 to vector<8x1xf32>
    %54 = arith.addf %52, %53 : vector<8x1xf32>
    %55 = tpu.reciprocal %54 : vector<8x1xf32> -> vector<8x1xf32>
    %56 = vector.broadcast %39 : f32 to vector<8x32xf32>
    %57 = arith.mulf %56, %46 : vector<8x32xf32>
    %58 = vector.broadcast %55 : vector<8x1xf32> to vector<8x32xf32>
    %59 = arith.mulf %57, %58 : vector<8x32xf32>
    %60 = vector.broadcast %40 : f32 to vector<8x32xf32>
    %61 = arith.addf %59, %60 : vector<8x32xf32>
    %c0_36 = arith.constant 0 : index
    %c0_37 = arith.constant 0 : index
    %62 = vector.load %arg8[%c0_36, %c0_37] : memref<8x32xf32, #tpu.memory_space<vmem>>, vector<8x32xf32>
    tpu.vector_store %arg8[%c0_36, %c0_37], %61 {strides = array<i32>} : memref<8x32xf32, #tpu.memory_space<vmem>>, vector<8x32xf32>,
    return
  }
  func.func @transform_0(%arg0: i32) -> i32 {
    %c0_i32 = arith.constant 0 : i32
    %c0_i32_0 = arith.constant 0 : i32
    return %c0_i32 : i32
  }
  func.func @transform_1(%arg0: i32) -> i32 {
    %c0_i32 = arith.constant 0 : i32
    %c0_i32_0 = arith.constant 0 : i32
    return %c0_i32 : i32
  }
  func.func @transform_2(%arg0: i32) -> (i32, i32) {
    %c0_i32 = arith.constant 0 : i32
    %c0_i32_0 = arith.constant 0 : i32
    return %arg0, %c0_i32 : i32, i32
  }
  func.func @transform_3(%arg0: i32) -> (i32, i32, i32) {
    %c0_i32 = arith.constant 0 : i32
    %c0_i32_0 = arith.constant 0 : i32
    %c0_i32_1 = arith.constant 0 : i32
    %c0_i32_2 = arith.constant 0 : i32
    return %c0_i32, %c0_i32_0, %c0_i32_1 : i32, i32, i32
  }
  func.func @transform_4(%arg0: i32) -> (i32, i32, i32) {
    %c0_i32 = arith.constant 0 : i32
    %c0_i32_0 = arith.constant 0 : i32
    %c0_i32_1 = arith.constant 0 : i32
    %c0_i32_2 = arith.constant 0 : i32
    return %c0_i32, %c0_i32_0, %c0_i32_1 : i32, i32, i32
  }
  func.func @transform_5(%arg0: i32) -> (i32, i32, i32) {
    %c0_i32 = arith.constant 0 : i32
    %c0_i32_0 = arith.constant 0 : i32
    %c0_i32_1 = arith.constant 0 : i32
    %c0_i32_2 = arith.constant 0 : i32
    return %c0_i32, %c0_i32_0, %c0_i32_1 : i32, i32, i32
  }
  func.func @transform_6(%arg0: i32) -> (i32, i32, i32) {
    %c0_i32 = arith.constant 0 : i32
    %c0_i32_0 = arith.constant 0 : i32
    %c0_i32_1 = arith.constant 0 : i32
    %c0_i32_2 = arith.constant 0 : i32
    return %c0_i32, %c0_i32_0, %c0_i32_1 : i32, i32, i32
  }
  func.func @transform_7(%arg0: i32) -> (i32, i32) {
    %c0_i32 = arith.constant 0 : i32
    %c0_i32_0 = arith.constant 0 : i32
    return %arg0, %c0_i32 : i32, i32
  }
}

</mosaic_0001>

<bundles_post_ra>
// kernel: tpu_custom_call.1
= control target key start
LH: loop header
LB: loop body
LE: loop exit
PB: predicated region body
PF: predicated region fallthrough
CT: control target
= control target key end

     0   :  { %s1121_s0 = inlined_call_operand.<no memory space> [shape: f32[1], index: 0, kind: input, shape index: {}]   ;;  %s1122_s1 = inlined_call_operand.<no memory space> [shape: f32[1], index: 1, kind: input, shape index: {}]   ;;  %s1123_s2 = inlined_call_operand.vmem [shape: f32[16,32], index: 2, kind: input, shape index: {}]   ;;  %s1124_s3 = inlined_call_operand.vmem [shape: bf16[2,32,64], index: 3, kind: input, shape index: {}]   ;;  %s1125_s4 = inlined_call_operand.vmem [shape: f32[2,1,64], index: 4, kind: input, shape index: {}]   ;;  %s1126_s5 = inlined_call_operand.vmem [shape: bf16[2,64,32], index: 5, kind: input, shape index: {}]   ;;  %s1127_s6 = inlined_call_operand.vmem [shape: f32[2,1,32], index: 6, kind: input, shape index: {}]   ;;  %s1128_s7 = inlined_call_operand.hbm [shape: f32[16,32], index: 7, kind: output, shape index: {}]  }
   0x1   :  { %12 = sst [smem:[#allocation2]] %s1121_s0 }
   0x2   :  { %13 = sst [smem:[#allocation3]] %s1122_s1 }
   0x3   :  { %14 = vsyncpa [#allocation5], 0 }
   0x4   :  { %16 = vsyncpa [#allocation5 + $0x1], 0  ;;  %s959_s28 = smov 0   ;;  %s961_s29 = smov 0  }
   0x5   :  { %s963_s30 = smov 0   ;;  %s965_s8 = smov 0  }
   0x6 LB: > { %s980_s0 = sadd.s32 4294967295, %s908_s8   ;;  %s691_s1 = sadd.s32 4294967294, %s908_s8   ;;  %s908_s8 = sphi %s965_s8, %s1134_s8   ;;  %s904_s30 = sphi %s963_s30, %s1133_s30   ;;  %s900_s29 = sphi %s961_s29, %s1132_s29   ;;  %s896_s28 = sphi %s959_s28, %s1131_s28  }
   0x7   : > { %s984_s9 = sadd.s32 1, %s908_s8   ;;  %s181_s10 = sadd.s32 1, %s904_s30 }
   0x8   : > { %s178_s11 = ssub.s32 %s908_s8, %s984_s9  ;;  %p191_p0 = scmp.ne.s32.totalorder %s904_s30, %s900_s29 }
   0x9   : > { %p179_p1 = scmp.eq.s32.totalorder %s178_s11, 0  ;;  %p192_p2 = scmp.eq.s32.totalorder %s980_s0, 1 }
   0xa   : > { %p197_p3 = scmp.ne.s32.totalorder %s900_s29, %s896_s28  ;;  %p198_p4 = scmp.eq.s32.totalorder %s691_s1, 1 }
   0xb   : > { %s995_s12 = scalar_select %p179_p1, %s904_s30, %s181_s10  }
   0xc   : > { %p997_p5 = por %p192_p2, %p191_p0  ;;  %p1001_p6 = por %p198_p4, %p197_p3 }
   0xd   : > { %p694_p7 = scmp.ge.s32.totalorder %s908_s8, 1  ;;  %p241_p8 = scmp.lt.s32.totalorder %s908_s8, 3 }
   0xf   : > { %p242_p9 = pnand %p694_p7, %p241_p8 }
  0x10   : > { %p272_p10 = scmp.lt.s32.totalorder (!%p242_p9), %s980_s0, 1  ;;  %s269_s21 = sand.u32 (!%p242_p9), 1, %s900_s29  }
  0x11   : > { %245 = sbr.rel (%p242_p9) target bundleno = 1162 (0x48a), region = 48  ;;  %s591_s22 = sld [smem:[#allocation3]] (!%p242_p9) }
  0x12   : > { %s695_s23 = sshll.u32 (!%p242_p9), %s269_s21, 3  ;;  %s732_s24 = sshll.u32 (!%p242_p9), %s980_s0, 7 }
  0x13   : > { %s630_s10 = scalar_lea.hbm (!%p242_p9), %s1128_s7, %s732_s24  ;;  %s619_s11 = scalar_lea.sflag (!%p242_p9), [#allocation5], %s269_s21 }
  0x14   : > { %s912_s16 = smov (!%p242_p9), [#allocation4]  }
  0x15   : > { %s852_s17 = sshll.u32 (!%p242_p9), %s912_s16, 4  ;;  %s853_s17 = int_to_ptr.vmem [resolvable:$false] %s852_s17 }
  0x16   : > { %v832_v0 = vld [vmem:[%s1124_s3 + $0x8] sm:$0xff]   ;;  %v910_v1 = vmov 0.0   ;;  %v833_v2 = vld [vmem:[%s1124_s3] sm:$0xff]   ;;  %vm911_vm0 = vmmov 0   ;;  %s273_s19 = scalar_select %p272_p10, %s980_s0, 1  ;;  %v834_v3 = vld [vmem:[%s1126_s5 + $0x18] sm:$0xff]  }
  0x17   : > { %751 = vmatprep.subr.bf16.mxu1 %v910_v1  ;;  %771 = vmatprep.subr.bf16.mxu0 %v910_v1  ;;  %vm311_vm1 = vcmask 261120   ;;  %v835_v6 = vld [vmem:[%s1126_s5 + $0x10] sm:$0xff]   ;;  %v836_v7 = vld [vmem:[%s1126_s5 + $0x8] sm:$0xff]   ;;  %v837_v8 = vld [vmem:[%s1126_s5] sm:$0xff]   ;;  %vm381_vm2 = vcmask 523264   ;;  %v615_v63 = vstv %s591_s22  ;;  %s854_s0 = scalar_lea.vmem %s853_s17, 256 }
  0x18   : > { %752 = vmatpush3.bf16.msra.mxu1 %v832_v0  ;;  %755 = vmatprep.mubr.msk.bf16.mxu1 %vm911_vm0, %v910_v1  ;;  %s696_s20 = sshll.u32 %s273_s19, 3  ;;  %v697_v9 = vld [vmem:[%s1125_s4] ss:$0 sm:$0xff]  ;;  %v838_v17 = vld [vmem:[%s1124_s3 + $0x18] sm:$0xff]   ;;  %v839_v18 = vld [vmem:[%s1124_s3 + $0x10] sm:$0xff]  }
  0x19   : > { %753 = vmatprep.subr.bf16.mxu1 %v910_v1  ;;  %775 = vmatprep.mubr.msk.bf16.mxu0 %vm911_vm0, %v910_v1  ;;  %s275_s25 = scalar_lea.vmem %s1123_s2, %s696_s20  ;;  %v706_v19 = vld [vmem:[%s1127_s6] ss:$0 sm:$0xff]  ;;  %v840_v25 = vld [vmem:[%s1126_s5 + $0x38] sm:$0xff]   ;;  %v841_v28 = vld [vmem:[%s1126_s5 + $0x30] sm:$0xff]   ;;  %s590_s20 = sld [smem:[#allocation2]] }
  0x1a   : > { %v277_v4 = vld [vmem:[%s275_s25] sm:$0xff]  ;;  %772 = vmatpush3.bf16.msra.mxu0 %v838_v17  ;;  %v842_v29 = vld [vmem:[%s1126_s5 + $0x28] sm:$0xff]   ;;  %s271_s25 = scalar_lea.vmem [#allocation4], %s695_s23 }
  0x1b   : > { %v292_v5 = vpack.c.bf16 %v277_v4, %v277_v4  ;;  %773 = vmatprep.subr.bf16.mxu0 %v910_v1  ;;  %v843_v30 = vld [vmem:[%s1126_s5 + $0x20] sm:$0xff]   ;;  %s632_s26 = sshll.u32 %s271_s25, 4  ;;  %s633_s26 = int_to_ptr.vmem [resolvable:$true] %s632_s26 }
  0x1c   : > { %754 = vmatpush3.bf16.msra.mxu1 %v833_v2  ;;  %v721_v31 = vld [vmem:[%s1125_s4 + $0x1] ss:$0 sm:$0xff]  ;;  %s848_s15 = scalar_lea.vmem %s633_s26, 128  ;;  %p855_p0 = scmp.lt.s32.totalorder %s633_s26, %s853_s17 }
  0x1d   : > { %759 = vmatprep.subr.bf16.mxu1 %v910_v1  ;;  %v730_v40 = vld [vmem:[%s1127_s6 + $0x1] ss:$0 sm:$0xff]  ;;  %p849_p11 = scmp.ne.s32.totalorder %s633_s26, %s848_s15  ;;  %p856_p1 = scmp.lt.s32.totalorder %s854_s0, %s848_s15 }
  0x1e   : > { %774 = vmatpush3.bf16.msra.mxu0 %v839_v18 }
  0x1f   : > { %756 = vmatmul.mubr.msk.bf16.vlgmr.msra.gmra.mxu1 %vm311_vm1, %v292_v5  ;;  %779 = vmatprep.subr.bf16.mxu0 %v910_v1  ;;  %v612_v60 = vstv %s590_s20  ;;  %p850_p12 = pnand %p849_p11, %p997_p5  ;;  %p857_p2 = por %p856_p1, %p855_p0 }
  0x20   : > { %760 = vmatpush3.bf16.msra.mxu1 %v834_v3  ;;  %767 = vmatprep.mubr.msk.bf16.mxu1 %vm911_vm0, %v910_v1 }
  0x21   : > { %761 = vmatprep.subr.bf16.mxu1 %v910_v1  ;;  %p851_p13 = pneg %p850_p12 }
  0x23   : > { %p858_p3 = pnand %p857_p2, %p851_p13 }
  0x24   : > { %762 = vmatpush3.bf16.msra.mxu1 %v835_v6 }
  0x25   : > { %763 = vmatprep.subr.bf16.mxu1 %v910_v1 }
  0x28   : > { %764 = vmatpush3.bf16.msra.mxu1 %v836_v7 }
  0x29   : > { %765 = vmatprep.subr.bf16.mxu1 %v910_v1 }
  0x2c   : > { %766 = vmatpush3.bf16.msra.mxu1 %v837_v8 }
  0xdf   : > { %v349_v10 = vpop.f32.mrf.mxu1 }
  0xe0   : > { %v350_v11 = vadd.f32 %v697_v9, %v349_v10 }
  0xe1   : > { %v757_v12 = vpop.f32.mrf.mxu1 }
  0xe2   : > { %v355_v13 = vmax.f32 %v350_v11, 0.0 }
  0xe3   : > { %v352_v14 = vpop.f32.mrf.mxu1 }
  0xe4   : > { %v356_v15 = vpack.c.bf16 %v355_v13, %v355_v13 }
  0xe5   : > { %v758_v16 = vpop.f32.mrf.mxu1 }
  0xe6   : > { %768 = vmatmul.mubr.msk.bf16.vlgmr.msra.gmra.mxu1 %vm381_vm2, %v356_v15 }
 0x1a6   : > { %v419_v20 = vpop.f32.mrf.mxu1 }
 0x1a7   : > { %v425_v21 = vadd.f32 %v419_v20, %v277_v4 }
 0x1a8   : > { %v769_v22 = vpop.f32.mrf.mxu1 }
 0x1a9   : > { %v432_v23 = vadd.f32 %v706_v19, %v425_v21 }
 0x1aa   : > { %v422_v24 = vpop.f32.mrf.mxu1 }
 0x1ab   : > { %v451_v26 = vpack.c.bf16 %v432_v23, %v432_v23 }
 0x1ac   : > { %v770_v27 = vpop.f32.mrf.mxu1 }
 0x1ad   : > { %776 = vmatmul.mubr.msk.bf16.vlgmr.msra.gmra.mxu0 %vm311_vm1, %v451_v26 }
 0x1ae   : > { %780 = vmatpush3.bf16.msra.mxu0 %v840_v25  ;;  %787 = vmatprep.mubr.msk.bf16.mxu0 %vm911_vm0, %v910_v1 }
 0x1af   : > { %781 = vmatprep.subr.bf16.mxu0 %v910_v1 }
 0x1b2   : > { %782 = vmatpush3.bf16.msra.mxu0 %v841_v28 }
 0x1b3   : > { %783 = vmatprep.subr.bf16.mxu0 %v910_v1 }
 0x1b6   : > { %784 = vmatpush3.bf16.msra.mxu0 %v842_v29 }
 0x1b7   : > { %785 = vmatprep.subr.bf16.mxu0 %v910_v1 }
 0x1ba   : > { %786 = vmatpush3.bf16.msra.mxu0 %v843_v30 }
 0x26d   : > { %v507_v32 = vpop.f32.mrf.mxu0 }
 0x26e   : > { %v508_v33 = vadd.f32 %v721_v31, %v507_v32 }
 0x26f   : > { %v777_v34 = vpop.f32.mrf.mxu0 }
 0x270   : > { %v513_v35 = vmax.f32 %v508_v33, 0.0 }
 0x271   : > { %v510_v36 = vpop.f32.mrf.mxu0 }
 0x272   : > { %v514_v37 = vpack.c.bf16 %v513_v35, %v513_v35 }
 0x273   : > { %v778_v38 = vpop.f32.mrf.mxu0 }
 0x274   : > { %788 = vmatmul.mubr.msk.bf16.vlgmr.msra.gmra.mxu0 %vm381_vm2, %v514_v37 }
 0x334   : > { %v576_v39 = vpop.f32.mrf.mxu0 }
 0x335   : > { %v582_v41 = vadd.f32 %v576_v39, %v432_v23 }
 0x336   : > { %v789_v42 = vpop.f32.mrf.mxu0 }
 0x337   : > { %v589_v43 = vadd.f32 %v730_v40, %v582_v41 }
 0x338   : > { %v579_v44 = vpop.f32.mrf.mxu0 }
 0x339   : > { %v592_v45 = vsel %vm311_vm1, %v589_v43, 0.0 }
 0x33a   : > { %593 = vadd.xlane.f32.xlu0 %v592_v45  ;;  %v790_v46 = vpop.f32.mrf.mxu0 }
 0x3c3   : > { %v594_v47 = vpop.xlane.xlu0 %593 }
 0x3c4   : > { %v596_v48 = vmul.f32 0.03125, %v594_v47 }
 0x3c6   : > { %v597_v49 = vsub.f32 %v589_v43, %v596_v48 }
 0x3c8   : > { %v598_v50 = vmul.f32 %v597_v49, %v597_v49  ;;  %v613_v61 = vmul.f32 %v612_v60, %v597_v49 }
 0x3ca   : > { %v599_v51 = vsel %vm311_vm1, %v598_v50, 0.0 }
 0x3cb   : > { %600 = vadd.xlane.f32.xlu0 %v599_v51 }
 0x454   : > { %v601_v52 = vpop.xlane.xlu0 %600 }
 0x455   : > { %v602_v53 = vmul.f32 0.032258064, %v601_v52 }
 0x457   : > { %844 = vrsqrt.f32 %v602_v53  ;;  %vm605_vm3 = vcmp.eq.f32.partialorder %v602_v53, inf  ;;  %v608_v56 = vand.u32 2147483648, %v602_v53  ;;  %vm607_vm4 = vcmp.eq.f32.partialorder %v602_v53, 0.0 }
 0x464   : > { %v845_v54 = vpop.eup %844 }
 0x465   : > { %v604_v55 = vmul.f32 %v845_v54, %v602_v53 }
 0x467   : > { %v606_v57 = vsel %vm605_vm3, %v602_v53, %v604_v55 }
 0x468   : > { %v609_v58 = vsel %vm607_vm4, %v608_v56, %v606_v57 }
 0x469   : > { %v610_v59 = vadd.f32 1e-06, %v609_v58 }
 0x46b   : > { %846 = vrcp.f32 %v610_v59 }
 0x478   : > { %v847_v62 = vpop.eup %846 }
 0x479   : > { %v614_v0 = vmul.f32 %v847_v62, %v613_v61 }
 0x47b   : > { %v616_v1 = vadd.f32 %v615_v63, %v614_v0 }
 0x47d   : > { %617 = vst.msk [vmem:[%s271_s25] sm:$0xff] %vm311_vm1, %v616_v1 }
 0x47e   : > { %861 = shalt.err (!%p858_p3)
}
 0x47f   : > { %s862_s18 = scalar_lea.hbm %s630_s10, 128  ;;  %s866_s21 = scalar_lea.hbm %s1128_s7, 256 }
 0x480   : > { %p863_p4 = scmp.ne.s32.totalorder %s630_s10, %s862_s18  ;;  %p867_p9 = scmp.lt.s32.totalorder %s630_s10, %s1128_s7 }
 0x481   : > { %p868_p10 = scmp.lt.s32.totalorder %s866_s21, %s862_s18 }
 0x482   : > { %p864_p7 = pnand %p863_p4, %p997_p5 }
 0x483   : > { %p869_p11 = por %p868_p10, %p867_p9 }
 0x484   : > { %p865_p8 = pneg %p864_p7 }
 0x486   : > { %p870_p12 = pnand %p869_p11, %p865_p8 }
 0x488   : > { %873 = shalt.err (!%p870_p12)
}
 0x489   : > { %791 = dma.vmem_to_hbm [thread:$0]  (%p997_p5), %s633_s26, 128, %s630_s10, %s619_s11  }
 0x48a PF: > { %p797_p13 = scmp.ge.s32.totalorder %s908_s8, 2  ;;  %s644_s24 = sand.u32 1, %s896_s28  }
 0x48b   : > { %s645_s25 = scalar_lea.sflag [#allocation5], %s644_s24 }
 0x48c   : > { %p794_p0 = pnand %p797_p13, %p1001_p6 }
 0x48e   : > { %p795_p1 = pneg %p794_p0 }
 0x490   : > { %891 = dma.done.wait (%p795_p1), %s645_s25, 128  }
 0x491   : > { %893 = vsyncadd (%p795_p1), %s645_s25, 4294967168  ;;  %p19_p2 = scmp.ge.s32.totalorder %s984_s9, 4   ;;  %s1131_s28 = smov %s900_s29 }
 0x492   : > { %s1132_s29 = smov %s904_s30  ;;  %s1133_s30 = smov %s995_s12 }
 0x493   : > { %s1134_s8 = smov %s984_s9  ;;  %21 = sbr.rel (!%p19_p2) target bundleno = 6 (0x6), region = 87 }
 0x498   :  { %650 = vsyncpa [#allocation5], 1 }
 0x499   :  { %652 = vsyncpa [#allocation5 + $0x1], 1 }

// kernel: tpu_custom_call.1
= control target key start
LH: loop header
LB: loop body
LE: loop exit
PB: predicated region body
PF: predicated region fallthrough
CT: control target
= control target key end

     0   :  { %s1121_s0 = inlined_call_operand.<no memory space> [shape: f32[1], index: 0, kind: input, shape index: {}]   ;;  %s1122_s1 = inlined_call_operand.<no memory space> [shape: f32[1], index: 1, kind: input, shape index: {}]   ;;  %s1123_s2 = inlined_call_operand.vmem [shape: f32[16,32], index: 2, kind: input, shape index: {}]   ;;  %s1124_s3 = inlined_call_operand.vmem [shape: bf16[2,32,64], index: 3, kind: input, shape index: {}]   ;;  %s1125_s4 = inlined_call_operand.vmem [shape: f32[2,1,64], index: 4, kind: input, shape index: {}]   ;;  %s1126_s5 = inlined_call_operand.vmem [shape: bf16[2,64,32], index: 5, kind: input, shape index: {}]   ;;  %s1127_s6 = inlined_call_operand.vmem [shape: f32[2,1,32], index: 6, kind: input, shape index: {}]   ;;  %s1128_s7 = inlined_call_operand.hbm [shape: f32[16,32], index: 7, kind: output, shape index: {}]  }
   0x1   :  { %12 = sst [smem:[#allocation2]] %s1121_s0 }
   0x2   :  { %13 = sst [smem:[#allocation3]] %s1122_s1 }
   0x3   :  { %14 = vsyncpa [#allocation5], 0 }
   0x4   :  { %16 = vsyncpa [#allocation5 + $0x1], 0  ;;  %s959_s28 = smov 0   ;;  %s961_s29 = smov 0  }
   0x5   :  { %s963_s30 = smov 0   ;;  %s965_s8 = smov 0  }
   0x6 LB: > { %s980_s0 = sadd.s32 4294967295, %s908_s8   ;;  %s691_s1 = sadd.s32 4294967294, %s908_s8   ;;  %s908_s8 = sphi %s965_s8, %s1134_s8   ;;  %s904_s30 = sphi %s963_s30, %s1133_s30   ;;  %s900_s29 = sphi %s961_s29, %s1132_s29   ;;  %s896_s28 = sphi %s959_s28, %s1131_s28  }
   0x7   : > { %s984_s9 = sadd.s32 1, %s908_s8   ;;  %s181_s10 = sadd.s32 1, %s904_s30 }
   0x8   : > { %s178_s11 = ssub.s32 %s908_s8, %s984_s9  ;;  %p191_p0 = scmp.ne.s32.totalorder %s904_s30, %s900_s29 }
   0x9   : > { %p179_p1 = scmp.eq.s32.totalorder %s178_s11, 0  ;;  %p192_p2 = scmp.eq.s32.totalorder %s980_s0, 1 }
   0xa   : > { %p197_p3 = scmp.ne.s32.totalorder %s900_s29, %s896_s28  ;;  %p198_p4 = scmp.eq.s32.totalorder %s691_s1, 1 }
   0xb   : > { %s995_s12 = scalar_select %p179_p1, %s904_s30, %s181_s10  }
   0xc   : > { %p997_p5 = por %p192_p2, %p191_p0  ;;  %p1001_p6 = por %p198_p4, %p197_p3 }
   0xd   : > { %p694_p7 = scmp.ge.s32.totalorder %s908_s8, 1  ;;  %p241_p8 = scmp.lt.s32.totalorder %s908_s8, 3 }
   0xf   : > { %p242_p9 = pnand %p694_p7, %p241_p8 }
  0x10   : > { %p272_p10 = scmp.lt.s32.totalorder (!%p242_p9), %s980_s0, 1  ;;  %s269_s21 = sand.u32 (!%p242_p9), 1, %s900_s29  }
  0x11   : > { %245 = sbr.rel (%p242_p9) target bundleno = 1162 (0x48a), region = 48  ;;  %s591_s22 = sld [smem:[#allocation3]] (!%p242_p9) }
  0x12   : > { %s695_s23 = sshll.u32 (!%p242_p9), %s269_s21, 3  ;;  %s732_s24 = sshll.u32 (!%p242_p9), %s980_s0, 7 }
  0x13   : > { %s630_s10 = scalar_lea.hbm (!%p242_p9), %s1128_s7, %s732_s24  ;;  %s619_s11 = scalar_lea.sflag (!%p242_p9), [#allocation5], %s269_s21 }
  0x14   : > { %s912_s16 = smov (!%p242_p9), [#allocation4]  }
  0x15   : > { %s852_s17 = sshll.u32 (!%p242_p9), %s912_s16, 4  ;;  %s853_s17 = int_to_ptr.vmem [resolvable:$false] %s852_s17 }
  0x16   : > { %v832_v0 = vld [vmem:[%s1124_s3 + $0x8] sm:$0xff]   ;;  %v910_v1 = vmov 0.0   ;;  %v833_v2 = vld [vmem:[%s1124_s3] sm:$0xff]   ;;  %vm911_vm0 = vmmov 0   ;;  %s273_s19 = scalar_select %p272_p10, %s980_s0, 1  ;;  %v834_v3 = vld [vmem:[%s1126_s5 + $0x18] sm:$0xff]  }
  0x17   : > { %751 = vmatprep.subr.bf16.mxu1 %v910_v1  ;;  %771 = vmatprep.subr.bf16.mxu0 %v910_v1  ;;  %vm311_vm1 = vcmask 261120   ;;  %v835_v6 = vld [vmem:[%s1126_s5 + $0x10] sm:$0xff]   ;;  %v836_v7 = vld [vmem:[%s1126_s5 + $0x8] sm:$0xff]   ;;  %v837_v8 = vld [vmem:[%s1126_s5] sm:$0xff]   ;;  %vm381_vm2 = vcmask 523264   ;;  %v615_v63 = vstv %s591_s22  ;;  %s854_s0 = scalar_lea.vmem %s853_s17, 256 }
  0x18   : > { %752 = vmatpush3.bf16.msra.mxu1 %v832_v0  ;;  %755 = vmatprep.mubr.msk.bf16.mxu1 %vm911_vm0, %v910_v1  ;;  %s696_s20 = sshll.u32 %s273_s19, 3  ;;  %v697_v9 = vld [vmem:[%s1125_s4] ss:$0 sm:$0xff]  ;;  %v838_v17 = vld [vmem:[%s1124_s3 + $0x18] sm:$0xff]   ;;  %v839_v18 = vld [vmem:[%s1124_s3 + $0x10] sm:$0xff]  }
  0x19   : > { %753 = vmatprep.subr.bf16.mxu1 %v910_v1  ;;  %775 = vmatprep.mubr.msk.bf16.mxu0 %vm911_vm0, %v910_v1  ;;  %s275_s25 = scalar_lea.vmem %s1123_s2, %s696_s20  ;;  %v706_v19 = vld [vmem:[%s1127_s6] ss:$0 sm:$0xff]  ;;  %v840_v25 = vld [vmem:[%s1126_s5 + $0x38] sm:$0xff]   ;;  %v841_v28 = vld [vmem:[%s1126_s5 + $0x30] sm:$0xff]   ;;  %s590_s20 = sld [smem:[#allocation2]] }
  0x1a   : > { %v277_v4 = vld [vmem:[%s275_s25] sm:$0xff]  ;;  %772 = vmatpush3.bf16.msra.mxu0 %v838_v17  ;;  %v842_v29 = vld [vmem:[%s1126_s5 + $0x28] sm:$0xff]   ;;  %s271_s25 = scalar_lea.vmem [#allocation4], %s695_s23 }
  0x1b   : > { %v292_v5 = vpack.c.bf16 %v277_v4, %v277_v4  ;;  %773 = vmatprep.subr.bf16.mxu0 %v910_v1  ;;  %v843_v30 = vld [vmem:[%s1126_s5 + $0x20] sm:$0xff]   ;;  %s632_s26 = sshll.u32 %s271_s25, 4  ;;  %s633_s26 = int_to_ptr.vmem [resolvable:$true] %s632_s26 }
  0x1c   : > { %754 = vmatpush3.bf16.msra.mxu1 %v833_v2  ;;  %v721_v31 = vld [vmem:[%s1125_s4 + $0x1] ss:$0 sm:$0xff]  ;;  %s848_s15 = scalar_lea.vmem %s633_s26, 128  ;;  %p855_p0 = scmp.lt.s32.totalorder %s633_s26, %s853_s17 }
  0x1d   : > { %759 = vmatprep.subr.bf16.mxu1 %v910_v1  ;;  %v730_v40 = vld [vmem:[%s1127_s6 + $0x1] ss:$0 sm:$0xff]  ;;  %p849_p11 = scmp.ne.s32.totalorder %s633_s26, %s848_s15  ;;  %p856_p1 = scmp.lt.s32.totalorder %s854_s0, %s848_s15 }
  0x1e   : > { %774 = vmatpush3.bf16.msra.mxu0 %v839_v18 }
  0x1f   : > { %756 = vmatmul.mubr.msk.bf16.vlgmr.msra.gmra.mxu1 %vm311_vm1, %v292_v5  ;;  %779 = vmatprep.subr.bf16.mxu0 %v910_v1  ;;  %v612_v60 = vstv %s590_s20  ;;  %p850_p12 = pnand %p849_p11, %p997_p5  ;;  %p857_p2 = por %p856_p1, %p855_p0 }
  0x20   : > { %760 = vmatpush3.bf16.msra.mxu1 %v834_v3  ;;  %767 = vmatprep.mubr.msk.bf16.mxu1 %vm911_vm0, %v910_v1 }
  0x21   : > { %761 = vmatprep.subr.bf16.mxu1 %v910_v1  ;;  %p851_p13 = pneg %p850_p12 }
  0x23   : > { %p858_p3 = pnand %p857_p2, %p851_p13 }
  0x24   : > { %762 = vmatpush3.bf16.msra.mxu1 %v835_v6 }
  0x25   : > { %763 = vmatprep.subr.bf16.mxu1 %v910_v1 }
  0x28   : > { %764 = vmatpush3.bf16.msra.mxu1 %v836_v7 }
  0x29   : > { %765 = vmatprep.subr.bf16.mxu1 %v910_v1 }
  0x2c   : > { %766 = vmatpush3.bf16.msra.mxu1 %v837_v8 }
  0xdf   : > { %v349_v10 = vpop.f32.mrf.mxu1 }
  0xe0   : > { %v350_v11 = vadd.f32 %v697_v9, %v349_v10 }
  0xe1   : > { %v757_v12 = vpop.f32.mrf.mxu1 }
  0xe2   : > { %v355_v13 = vmax.f32 %v350_v11, 0.0 }
  0xe3   : > { %v352_v14 = vpop.f32.mrf.mxu1 }
  0xe4   : > { %v356_v15 = vpack.c.bf16 %v355_v13, %v355_v13 }
  0xe5   : > { %v758_v16 = vpop.f32.mrf.mxu1 }
  0xe6   : > { %768 = vmatmul.mubr.msk.bf16.vlgmr.msra.gmra.mxu1 %vm381_vm2, %v356_v15 }
 0x1a6   : > { %v419_v20 = vpop.f32.mrf.mxu1 }
 0x1a7   : > { %v425_v21 = vadd.f32 %v419_v20, %v277_v4 }
 0x1a8   : > { %v769_v22 = vpop.f32.mrf.mxu1 }
 0x1a9   : > { %v432_v23 = vadd.f32 %v706_v19, %v425_v21 }
 0x1aa   : > { %v422_v24 = vpop.f32.mrf.mxu1 }
 0x1ab   : > { %v451_v26 = vpack.c.bf16 %v432_v23, %v432_v23 }
 0x1ac   : > { %v770_v27 = vpop.f32.mrf.mxu1 }
 0x1ad   : > { %776 = vmatmul.mubr.msk.bf16.vlgmr.msra.gmra.mxu0 %vm311_vm1, %v451_v26 }
 0x1ae   : > { %780 = vmatpush3.bf16.msra.mxu0 %v840_v25  ;;  %787 = vmatprep.mubr.msk.bf16.mxu0 %vm911_vm0, %v910_v1 }
 0x1af   : > { %781 = vmatprep.subr.bf16.mxu0 %v910_v1 }
 0x1b2   : > { %782 = vmatpush3.bf16.msra.mxu0 %v841_v28 }
 0x1b3   : > { %783 = vmatprep.subr.bf16.mxu0 %v910_v1 }
 0x1b6   : > { %784 = vmatpush3.bf16.msra.mxu0 %v842_v29 }
 0x1b7   : > { %785 = vmatprep.subr.bf16.mxu0 %v910_v1 }
 0x1ba   : > { %786 = vmatpush3.bf16.msra.mxu0 %v843_v30 }
 0x26d   : > { %v507_v32 = vpop.f32.mrf.mxu0 }
 0x26e   : > { %v508_v33 = vadd.f32 %v721_v31, %v507_v32 }
 0x26f   : > { %v777_v34 = vpop.f32.mrf.mxu0 }
 0x270   : > { %v513_v35 = vmax.f32 %v508_v33, 0.0 }
 0x271   : > { %v510_v36 = vpop.f32.mrf.mxu0 }
 0x272   : > { %v514_v37 = vpack.c.bf16 %v513_v35, %v513_v35 }
 0x273   : > { %v778_v38 = vpop.f32.mrf.mxu0 }
 0x274   : > { %788 = vmatmul.mubr.msk.bf16.vlgmr.msra.gmra.mxu0 %vm381_vm2, %v514_v37 }
 0x334   : > { %v576_v39 = vpop.f32.mrf.mxu0 }
 0x335   : > { %v582_v41 = vadd.f32 %v576_v39, %v432_v23 }
 0x336   : > { %v789_v42 = vpop.f32.mrf.mxu0 }
 0x337   : > { %v589_v43 = vadd.f32 %v730_v40, %v582_v41 }
 0x338   : > { %v579_v44 = vpop.f32.mrf.mxu0 }
 0x339   : > { %v592_v45 = vsel %vm311_vm1, %v589_v43, 0.0 }
 0x33a   : > { %593 = vadd.xlane.f32.xlu0 %v592_v45  ;;  %v790_v46 = vpop.f32.mrf.mxu0 }
 0x3c3   : > { %v594_v47 = vpop.xlane.xlu0 %593 }
 0x3c4   : > { %v596_v48 = vmul.f32 0.03125, %v594_v47 }
 0x3c6   : > { %v597_v49 = vsub.f32 %v589_v43, %v596_v48 }
 0x3c8   : > { %v598_v50 = vmul.f32 %v597_v49, %v597_v49  ;;  %v613_v61 = vmul.f32 %v612_v60, %v597_v49 }
 0x3ca   : > { %v599_v51 = vsel %vm311_vm1, %v598_v50, 0.0 }
 0x3cb   : > { %600 = vadd.xlane.f32.xlu0 %v599_v51 }
 0x454   : > { %v601_v52 = vpop.xlane.xlu0 %600 }
 0x455   : > { %v602_v53 = vmul.f32 0.032258064, %v601_v52 }
 0x457   : > { %844 = vrsqrt.f32 %v602_v53  ;;  %vm605_vm3 = vcmp.eq.f32.partialorder %v602_v53, inf  ;;  %v608_v56 = vand.u32 2147483648, %v602_v53  ;;  %vm607_vm4 = vcmp.eq.f32.partialorder %v602_v53, 0.0 }
 0x464   : > { %v845_v54 = vpop.eup %844 }
 0x465   : > { %v604_v55 = vmul.f32 %v845_v54, %v602_v53 }
 0x467   : > { %v606_v57 = vsel %vm605_vm3, %v602_v53, %v604_v55 }
 0x468   : > { %v609_v58 = vsel %vm607_vm4, %v608_v56, %v606_v57 }
 0x469   : > { %v610_v59 = vadd.f32 1e-06, %v609_v58 }
 0x46b   : > { %846 = vrcp.f32 %v610_v59 }
 0x478   : > { %v847_v62 = vpop.eup %846 }
 0x479   : > { %v614_v0 = vmul.f32 %v847_v62, %v613_v61 }
 0x47b   : > { %v616_v1 = vadd.f32 %v615_v63, %v614_v0 }
 0x47d   : > { %617 = vst.msk [vmem:[%s271_s25] sm:$0xff] %vm311_vm1, %v616_v1 }
 0x47e   : > { %861 = shalt.err (!%p858_p3)
}
 0x47f   : > { %s862_s18 = scalar_lea.hbm %s630_s10, 128  ;;  %s866_s21 = scalar_lea.hbm %s1128_s7, 256 }
 0x480   : > { %p863_p4 = scmp.ne.s32.totalorder %s630_s10, %s862_s18  ;;  %p867_p9 = scmp.lt.s32.totalorder %s630_s10, %s1128_s7 }
 0x481   : > { %p868_p10 = scmp.lt.s32.totalorder %s866_s21, %s862_s18 }
 0x482   : > { %p864_p7 = pnand %p863_p4, %p997_p5 }
 0x483   : > { %p869_p11 = por %p868_p10, %p867_p9 }
 0x484   : > { %p865_p8 = pneg %p864_p7 }
 0x486   : > { %p870_p12 = pnand %p869_p11, %p865_p8 }
 0x488   : > { %873 = shalt.err (!%p870_p12)
}
 0x489   : > { %791 = dma.vmem_to_hbm [thread:$0]  (%p997_p5), %s633_s26, 128, %s630_s10, %s619_s11  }
 0x48a PF: > { %p797_p13 = scmp.ge.s32.totalorder %s908_s8, 2  ;;  %s644_s24 = sand.u32 1, %s896_s28  }
 0x48b   : > { %s645_s25 = scalar_lea.sflag [#allocation5], %s644_s24 }
 0x48c   : > { %p794_p0 = pnand %p797_p13, %p1001_p6 }
 0x48e   : > { %p795_p1 = pneg %p794_p0 }
 0x490   : > { %891 = dma.done.wait (%p795_p1), %s645_s25, 128  }
 0x491   : > { %893 = vsyncadd (%p795_p1), %s645_s25, 4294967168  ;;  %p19_p2 = scmp.ge.s32.totalorder %s984_s9, 4   ;;  %s1131_s28 = smov %s900_s29 }
 0x492   : > { %s1132_s29 = smov %s904_s30  ;;  %s1133_s30 = smov %s995_s12 }
 0x493   : > { %s1134_s8 = smov %s984_s9  ;;  %21 = sbr.rel (!%p19_p2) target bundleno = 6 (0x6), region = 87 }
 0x498   :  { %650 = vsyncpa [#allocation5], 1 }
 0x499   :  { %652 = vsyncpa [#allocation5 + $0x1], 1 }

</bundles_post_ra>
